<compile_context>
chip_gen: v7x
topology: tpu7x:2x2x1
jax: 0.10.0
libtpu: 0.0.40
codegen_flags: <defaults>
</compile_context>

<pallas_src>
import functools

import jax
import jax.numpy as jnp
from jax import lax
from jax.experimental import pallas as pl
from jax.experimental.pallas import tpu as pltpu

ALPHA = 0.9
BETA = 0.1
GAMMA = 2.0

_LANE = 128
_TM = 4096   # rows per block: 4096*128*4B = 2 MiB per f32 input block


def _round_up(x, m):
    return ((x + m - 1) // m) * m


def _ft_partials_kernel(x_ref, t_ref, out_ref, acc_st, acc_s, acc_t, *,
                        rows, tm):
    j = pl.program_id(0)

    @pl.when(j == 0)
    def _():
        acc_st[...] = jnp.zeros_like(acc_st)
        acc_s[...] = jnp.zeros_like(acc_s)
        acc_t[...] = jnp.zeros_like(acc_t)

    x = x_ref[...].astype(jnp.float32)
    t = t_ref[...].astype(jnp.float32)
    # sigmoid(x) == 0.5 * (tanh(0.5 * x) + 1): single EUP op per element.
    s = 0.5 * (jnp.tanh(x * 0.5) + 1.0)

    def accumulate(sv, tv):
        # (tm, 128) -> (tm//8, 8, 128); sum over axis 0 is pure vreg-wise
        # VALU adds into one (8, 128) vreg accumulator (no XLU, no full-tile
        # accumulator stores).
        acc_st[...] += jnp.sum((sv * tv).reshape(tm // 8, 8, _LANE), axis=0)
        acc_s[...] += jnp.sum(sv.reshape(tm // 8, 8, _LANE), axis=0)
        acc_t[...] += jnp.sum(tv.reshape(tm // 8, 8, _LANE), axis=0)

    # Only the last block can be partial (or fully Pallas-padded when
    # tm > rows); gate the per-element mask so full blocks stay unmasked.
    is_full = (j + 1) * tm <= rows

    @pl.when(is_full)
    def _():
        accumulate(s, t)

    @pl.when(jnp.logical_not(is_full))
    def _():
        row_ids = j * tm + lax.broadcasted_iota(jnp.int32, (tm, _LANE), 0)
        valid = row_ids < rows
        # Select-style masking: garbage (incl. NaN) in out-of-range rows is
        # dropped, not multiplied.
        accumulate(jnp.where(valid, s, 0.0), jnp.where(valid, t, 0.0))

    @pl.when(j == pl.num_programs(0) - 1)
    def _():
        # One sublane (XLU) reduce per accumulator, once per kernel.
        out_ref[0:1, :] = jnp.sum(acc_st[...], axis=0, keepdims=True)
        out_ref[1:2, :] = jnp.sum(acc_s[...], axis=0, keepdims=True)
        out_ref[2:3, :] = jnp.sum(acc_t[...], axis=0, keepdims=True)


def focal_tversky_loss(inputs, targets, smooth=1.0, alpha=ALPHA, beta=BETA,
                       gamma=GAMMA):
    x = inputs.reshape(-1)
    t = targets.reshape(-1)
    n = x.shape[0]

    # Only if numel is not a multiple of 128 do we pad the lane tail.
    # Padded logits use a large finite negative so sigmoid == 0 exactly
    # (also bf16-representable); padded targets are 0.
    if n % _LANE != 0:
        pad = _LANE - n % _LANE
        x = jnp.pad(x, (0, pad), constant_values=jnp.asarray(-1e4, x.dtype))
        t = jnp.pad(t, (0, pad), constant_values=jnp.asarray(0, t.dtype))

    rows = x.shape[0] // _LANE
    x2 = x.reshape(rows, _LANE)   # free reshape (no copy) in the common case
    t2 = t.reshape(rows, _LANE)

    # Row tile: multiple of 16 (safe for bf16 sublane packing), clamped for
    # small inputs.  Tail / Pallas-padded rows are masked in-kernel.
    tm = min(_TM, _round_up(rows, 16))
    blocks = pl.cdiv(rows, tm)

    kernel = functools.partial(_ft_partials_kernel, rows=rows, tm=tm)

    partials = pl.pallas_call(
        kernel,
        out_shape=jax.ShapeDtypeStruct((3, _LANE), jnp.float32),
        grid_spec=pltpu.PrefetchScalarGridSpec(
            num_scalar_prefetch=0,
            grid=(blocks,),
            in_specs=[
                pl.BlockSpec((tm, _LANE), lambda j: (j, 0)),
                pl.BlockSpec((tm, _LANE), lambda j: (j, 0)),
            ],
            out_specs=pl.BlockSpec((3, _LANE), lambda j: (0, 0)),
            scratch_shapes=[
                pltpu.VMEM((8, _LANE), jnp.float32),  # acc sum(s*t)
                pltpu.VMEM((8, _LANE), jnp.float32),  # acc sum(s)
                pltpu.VMEM((8, _LANE), jnp.float32),  # acc sum(t)
            ],
        ),
        compiler_params=pltpu.CompilerParams(
            dimension_semantics=("arbitrary",)),
    )(x2, t2)

    # Tiny O(1) epilogue: lane-reduce the packed partials and apply the
    # Tversky / focal formula (FP = sum(s) - TP, FN = sum(t) - TP).
    TP = jnp.sum(partials[0])
    sum_s = jnp.sum(partials[1])
    sum_t = jnp.sum(partials[2])
    FP = sum_s - TP
    FN = sum_t - TP
    smooth = jnp.float32(smooth)
    tversky = (TP + smooth) / (TP + alpha * FN + beta * FP + smooth)
    return (1.0 - tversky) ** gamma


def _reference(inputs, targets, smooth=1.0, alpha=ALPHA, beta=BETA,
               gamma=GAMMA):
    s = jax.nn.sigmoid(inputs.reshape(-1).astype(jnp.float32))
    t = targets.reshape(-1).astype(jnp.float32)
    TP = jnp.sum(s * t)
    FP = jnp.sum((1.0 - t) * s)
    FN = jnp.sum(t * (1.0 - s))
    tversky = (TP + smooth) / (TP + alpha * FN + beta * FP + smooth)
    return (1.0 - tversky) ** gamma


if __name__ == "__main__":
    key = jax.random.PRNGKey(0)
    k1, k2 = jax.random.split(key)
    # Matches FocalTverskyLoss usage: logits and binary mask of same shape.
    inputs = jax.random.normal(k1, (2, 4, 16, 16), dtype=jnp.float32)
    targets = (jax.random.uniform(k2, (2, 4, 16, 16)) > 0.5).astype(jnp.float32)

    loss = jax.block_until_ready(focal_tversky_loss(inputs, targets))
    ref = jax.block_until_ready(_reference(inputs, targets))
    assert jnp.allclose(loss, ref, atol=1e-5, rtol=1e-5), (loss, ref)
    print("KERNEL_OK")
</pallas_src>

<mosaic_0001>
module attributes {stable_mosaic.version = 11 : i64} {
  func.func @_ft_partials_kernel(%arg0: i32, %arg1: memref<16x128xf32, #tpu.memory_space<vmem>>, %arg2: memref<16x128xf32, #tpu.memory_space<vmem>>, %arg3: memref<3x128xf32, #tpu.memory_space<vmem>>, %arg4: memref<8x128xf32, #tpu.memory_space<vmem>>, %arg5: memref<8x128xf32, #tpu.memory_space<vmem>>, %arg6: memref<8x128xf32, #tpu.memory_space<vmem>>) attributes {dimension_semantics = [#tpu.dimension_semantics<arbitrary>], iteration_bounds = array<i64: 1>, scalar_prefetch = 0 : i64, scratch_operands = 3 : i64, tpu.core_type = #tpu.core_type<tc>, window_params = [{transform_indices = @transform_0, window_bounds = array<i64: 16, 128>}, {transform_indices = @transform_1, window_bounds = array<i64: 16, 128>}, {pipeline_mode = #tpu.pipeline_mode<synchronous>, transform_indices = @transform_2, window_bounds = array<i64: 3, 128>}]} {
    %c0_i32 = arith.constant 0 : i32
    %0 = arith.cmpi eq, %arg0, %c0_i32 : i32
    %1 = arith.extui %0 : i1 to i32
    %c0_i32_0 = arith.constant 0 : i32
    %2 = arith.cmpi ne, %1, %c0_i32_0 : i32
    scf.if %2 {
      %cst_11 = arith.constant 0.000000e+00 : f32
      %23 = vector.broadcast %cst_11 : f32 to vector<8x128xf32>
      %c0_12 = arith.constant 0 : index
      %c0_13 = arith.constant 0 : index
      %24 = vector.load %arg4[%c0_12, %c0_13] : memref<8x128xf32, #tpu.memory_space<vmem>>, vector<8x128xf32>
      tpu.vector_store %arg4[%c0_12, %c0_13], %23 {strides = array<i32>} : memref<8x128xf32, #tpu.memory_space<vmem>>, vector<8x128xf32>,
      %cst_14 = arith.constant 0.000000e+00 : f32
      %25 = vector.broadcast %cst_14 : f32 to vector<8x128xf32>
      %c0_15 = arith.constant 0 : index
      %c0_16 = arith.constant 0 : index
      %26 = vector.load %arg5[%c0_15, %c0_16] : memref<8x128xf32, #tpu.memory_space<vmem>>, vector<8x128xf32>
      tpu.vector_store %arg5[%c0_15, %c0_16], %25 {strides = array<i32>} : memref<8x128xf32, #tpu.memory_space<vmem>>, vector<8x128xf32>,
      %cst_17 = arith.constant 0.000000e+00 : f32
      %27 = vector.broadcast %cst_17 : f32 to vector<8x128xf32>
      %c0_18 = arith.constant 0 : index
      %c0_19 = arith.constant 0 : index
      %28 = vector.load %arg6[%c0_18, %c0_19] : memref<8x128xf32, #tpu.memory_space<vmem>>, vector<8x128xf32>
      tpu.vector_store %arg6[%c0_18, %c0_19], %27 {strides = array<i32>} : memref<8x128xf32, #tpu.memory_space<vmem>>, vector<8x128xf32>,
    } else {
    }
    %c0 = arith.constant 0 : index
    %c0_1 = arith.constant 0 : index
    %3 = vector.load %arg1[%c0, %c0_1] : memref<16x128xf32, #tpu.memory_space<vmem>>, vector<16x128xf32>
    %c0_2 = arith.constant 0 : index
    %c0_3 = arith.constant 0 : index
    %4 = vector.load %arg2[%c0_2, %c0_3] : memref<16x128xf32, #tpu.memory_space<vmem>>, vector<16x128xf32>
    %cst = arith.constant 5.000000e-01 : f32
    %5 = vector.broadcast %cst : f32 to vector<16x128xf32>
    %6 = arith.mulf %3, %5 : vector<16x128xf32>
    %7 = math.tanh %6 : vector<16x128xf32>
    %cst_4 = arith.constant 1.000000e+00 : f32
    %8 = vector.broadcast %cst_4 : f32 to vector<16x128xf32>
    %9 = arith.addf %7, %8 : vector<16x128xf32>
    %cst_5 = arith.constant 5.000000e-01 : f32
    %10 = vector.broadcast %cst_5 : f32 to vector<16x128xf32>
    %11 = arith.mulf %10, %9 : vector<16x128xf32>
    %c1_i32 = arith.constant 1 : i32
    %12 = arith.addi %arg0, %c1_i32 : i32
    %c16_i32 = arith.constant 16 : i32
    %13 = arith.muli %12, %c16_i32 : i32
    %c16_i32_6 = arith.constant 16 : i32
    %14 = arith.cmpi sle, %13, %c16_i32_6 : i32
    %15 = arith.extui %14 : i1 to i32
    %c0_i32_7 = arith.constant 0 : i32
    %16 = arith.cmpi ne, %15, %c0_i32_7 : i32
    scf.if %16 {
      %c0_11 = arith.constant 0 : index
      %c0_12 = arith.constant 0 : index
      %23 = vector.load %arg4[%c0_11, %c0_12] : memref<8x128xf32, #tpu.memory_space<vmem>>, vector<8x128xf32>
      %24 = arith.mulf %11, %4 : vector<16x128xf32>
      %25 = vector.shape_cast %24 : vector<16x128xf32> to vector<2x8x128xf32>
      %cst_13 = arith.constant dense<0.000000e+00> : vector<8x128xf32>
      %26 = vector.multi_reduction <add>, %25, %cst_13 [0] : vector<2x8x128xf32> to vector<8x128xf32>
      %27 = arith.addf %23, %26 : vector<8x128xf32>
      %c0_14 = arith.constant 0 : index
      %c0_15 = arith.constant 0 : index
      %28 = vector.load %arg4[%c0_14, %c0_15] : memref<8x128xf32, #tpu.memory_space<vmem>>, vector<8x128xf32>
      tpu.vector_store %arg4[%c0_14, %c0_15], %27 {strides = array<i32>} : memref<8x128xf32, #tpu.memory_space<vmem>>, vector<8x128xf32>,
      %c0_16 = arith.constant 0 : index
      %c0_17 = arith.constant 0 : index
      %29 = vector.load %arg5[%c0_16, %c0_17] : memref<8x128xf32, #tpu.memory_space<vmem>>, vector<8x128xf32>
      %30 = vector.shape_cast %11 : vector<16x128xf32> to vector<2x8x128xf32>
      %cst_18 = arith.constant dense<0.000000e+00> : vector<8x128xf32>
      %31 = vector.multi_reduction <add>, %30, %cst_18 [0] : vector<2x8x128xf32> to vector<8x128xf32>
      %32 = arith.addf %29, %31 : vector<8x128xf32>
      %c0_19 = arith.constant 0 : index
      %c0_20 = arith.constant 0 : index
      %33 = vector.load %arg5[%c0_19, %c0_20] : memref<8x128xf32, #tpu.memory_space<vmem>>, vector<8x128xf32>
      tpu.vector_store %arg5[%c0_19, %c0_20], %32 {strides = array<i32>} : memref<8x128xf32, #tpu.memory_space<vmem>>, vector<8x128xf32>,
      %c0_21 = arith.constant 0 : index
      %c0_22 = arith.constant 0 : index
      %34 = vector.load %arg6[%c0_21, %c0_22] : memref<8x128xf32, #tpu.memory_space<vmem>>, vector<8x128xf32>
      %35 = vector.shape_cast %4 : vector<16x128xf32> to vector<2x8x128xf32>
      %cst_23 = arith.constant dense<0.000000e+00> : vector<8x128xf32>
      %36 = vector.multi_reduction <add>, %35, %cst_23 [0] : vector<2x8x128xf32> to vector<8x128xf32>
      %37 = arith.addf %34, %36 : vector<8x128xf32>
      %c0_24 = arith.constant 0 : index
      %c0_25 = arith.constant 0 : index
      %38 = vector.load %arg6[%c0_24, %c0_25] : memref<8x128xf32, #tpu.memory_space<vmem>>, vector<8x128xf32>
      tpu.vector_store %arg6[%c0_24, %c0_25], %37 {strides = array<i32>} : memref<8x128xf32, #tpu.memory_space<vmem>>, vector<8x128xf32>,
    } else {
    }
    %true = arith.constant true
    %17 = arith.xori %14, %true : i1
    %18 = arith.extui %17 : i1 to i32
    %c0_i32_8 = arith.constant 0 : i32
    %19 = arith.cmpi ne, %18, %c0_i32_8 : i32
    scf.if %19 {
      %c16_i32_11 = arith.constant 16 : i32
      %23 = arith.muli %arg0, %c16_i32_11 : i32
      %24 = tpu.iota {dimensions = array<i32: 0>} : vector<16x128xi32>
      %25 = vector.broadcast %23 : i32 to vector<16x128xi32>
      %26 = arith.addi %25, %24 : vector<16x128xi32>
      %c16_i32_12 = arith.constant 16 : i32
      %27 = vector.broadcast %c16_i32_12 : i32 to vector<16x128xi32>
      %28 = arith.cmpi slt, %26, %27 : vector<16x128xi32>
      %cst_13 = arith.constant 0.000000e+00 : f32
      %29 = vector.broadcast %cst_13 : f32 to vector<16x128xf32>
      %30 = arith.select %28, %11, %29 : vector<16x128xi1>, vector<16x128xf32>
      %cst_14 = arith.constant 0.000000e+00 : f32
      %31 = vector.broadcast %cst_14 : f32 to vector<16x128xf32>
      %32 = arith.select %28, %4, %31 : vector<16x128xi1>, vector<16x128xf32>
      %c0_15 = arith.constant 0 : index
      %c0_16 = arith.constant 0 : index
      %33 = vector.load %arg4[%c0_15, %c0_16] : memref<8x128xf32, #tpu.memory_space<vmem>>, vector<8x128xf32>
      %34 = arith.mulf %30, %32 : vector<16x128xf32>
      %35 = vector.shape_cast %34 : vector<16x128xf32> to vector<2x8x128xf32>
      %cst_17 = arith.constant dense<0.000000e+00> : vector<8x128xf32>
      %36 = vector.multi_reduction <add>, %35, %cst_17 [0] : vector<2x8x128xf32> to vector<8x128xf32>
      %37 = arith.addf %33, %36 : vector<8x128xf32>
      %c0_18 = arith.constant 0 : index
      %c0_19 = arith.constant 0 : index
      %38 = vector.load %arg4[%c0_18, %c0_19] : memref<8x128xf32, #tpu.memory_space<vmem>>, vector<8x128xf32>
      tpu.vector_store %arg4[%c0_18, %c0_19], %37 {strides = array<i32>} : memref<8x128xf32, #tpu.memory_space<vmem>>, vector<8x128xf32>,
      %c0_20 = arith.constant 0 : index
      %c0_21 = arith.constant 0 : index
      %39 = vector.load %arg5[%c0_20, %c0_21] : memref<8x128xf32, #tpu.memory_space<vmem>>, vector<8x128xf32>
      %40 = vector.shape_cast %30 : vector<16x128xf32> to vector<2x8x128xf32>
      %cst_22 = arith.constant dense<0.000000e+00> : vector<8x128xf32>
      %41 = vector.multi_reduction <add>, %40, %cst_22 [0] : vector<2x8x128xf32> to vector<8x128xf32>
      %42 = arith.addf %39, %41 : vector<8x128xf32>
      %c0_23 = arith.constant 0 : index
      %c0_24 = arith.constant 0 : index
      %43 = vector.load %arg5[%c0_23, %c0_24] : memref<8x128xf32, #tpu.memory_space<vmem>>, vector<8x128xf32>
      tpu.vector_store %arg5[%c0_23, %c0_24], %42 {strides = array<i32>} : memref<8x128xf32, #tpu.memory_space<vmem>>, vector<8x128xf32>,
      %c0_25 = arith.constant 0 : index
      %c0_26 = arith.constant 0 : index
      %44 = vector.load %arg6[%c0_25, %c0_26] : memref<8x128xf32, #tpu.memory_space<vmem>>, vector<8x128xf32>
      %45 = vector.shape_cast %32 : vector<16x128xf32> to vector<2x8x128xf32>
      %cst_27 = arith.constant dense<0.000000e+00> : vector<8x128xf32>
      %46 = vector.multi_reduction <add>, %45, %cst_27 [0] : vector<2x8x128xf32> to vector<8x128xf32>
      %47 = arith.addf %44, %46 : vector<8x128xf32>
      %c0_28 = arith.constant 0 : index
      %c0_29 = arith.constant 0 : index
      %48 = vector.load %arg6[%c0_28, %c0_29] : memref<8x128xf32, #tpu.memory_space<vmem>>, vector<8x128xf32>
      tpu.vector_store %arg6[%c0_28, %c0_29], %47 {strides = array<i32>} : memref<8x128xf32, #tpu.memory_space<vmem>>, vector<8x128xf32>,
    } else {
    }
    %c0_i32_9 = arith.constant 0 : i32
    %20 = arith.cmpi eq, %arg0, %c0_i32_9 : i32
    %21 = arith.extui %20 : i1 to i32
    %c0_i32_10 = arith.constant 0 : i32
    %22 = arith.cmpi ne, %21, %c0_i32_10 : i32
    scf.if %22 {
      %c0_11 = arith.constant 0 : index
      %c0_12 = arith.constant 0 : index
      %23 = vector.load %arg4[%c0_11, %c0_12] : memref<8x128xf32, #tpu.memory_space<vmem>>, vector<8x128xf32>
      %cst_13 = arith.constant dense<0.000000e+00> : vector<128xf32>
      %24 = vector.multi_reduction <add>, %23, %cst_13 [0] : vector<8x128xf32> to vector<128xf32>
      %25 = vector.shape_cast %24 : vector<128xf32> to vector<1x128xf32>
      %c0_14 = arith.constant 0 : index
      %c0_15 = arith.constant 0 : index
      %26 = vector.load %arg3[%c0_14, %c0_15] : memref<3x128xf32, #tpu.memory_space<vmem>>, vector<1x128xf32>
      tpu.vector_store %arg3[%c0_14, %c0_15], %25 {strides = array<i32>} : memref<3x128xf32, #tpu.memory_space<vmem>>, vector<1x128xf32>,
      %c0_16 = arith.constant 0 : index
      %c0_17 = arith.constant 0 : index
      %27 = vector.load %arg5[%c0_16, %c0_17] : memref<8x128xf32, #tpu.memory_space<vmem>>, vector<8x128xf32>
      %cst_18 = arith.constant dense<0.000000e+00> : vector<128xf32>
      %28 = vector.multi_reduction <add>, %27, %cst_18 [0] : vector<8x128xf32> to vector<128xf32>
      %29 = vector.shape_cast %28 : vector<128xf32> to vector<1x128xf32>
      %c1 = arith.constant 1 : index
      %c0_19 = arith.constant 0 : index
      %30 = vector.load %arg3[%c1, %c0_19] : memref<3x128xf32, #tpu.memory_space<vmem>>, vector<1x128xf32>
      tpu.vector_store %arg3[%c1, %c0_19], %29 {strides = array<i32>} : memref<3x128xf32, #tpu.memory_space<vmem>>, vector<1x128xf32>,
      %c0_20 = arith.constant 0 : index
      %c0_21 = arith.constant 0 : index
      %31 = vector.load %arg6[%c0_20, %c0_21] : memref<8x128xf32, #tpu.memory_space<vmem>>, vector<8x128xf32>
      %cst_22 = arith.constant dense<0.000000e+00> : vector<128xf32>
      %32 = vector.multi_reduction <add>, %31, %cst_22 [0] : vector<8x128xf32> to vector<128xf32>
      %33 = vector.shape_cast %32 : vector<128xf32> to vector<1x128xf32>
      %c2 = arith.constant 2 : index
      %c0_23 = arith.constant 0 : index
      %34 = vector.load %arg3[%c2, %c0_23] : memref<3x128xf32, #tpu.memory_space<vmem>>, vector<1x128xf32>
      tpu.vector_store %arg3[%c2, %c0_23], %33 {strides = array<i32>} : memref<3x128xf32, #tpu.memory_space<vmem>>, vector<1x128xf32>,
    } else {
    }
    return
  }
  func.func @transform_0(%arg0: i32) -> (i32, i32) {
    %c0_i32 = arith.constant 0 : i32
    %c0_i32_0 = arith.constant 0 : i32
    return %arg0, %c0_i32 : i32, i32
  }
  func.func @transform_1(%arg0: i32) -> (i32, i32) {
    %c0_i32 = arith.constant 0 : i32
    %c0_i32_0 = arith.constant 0 : i32
    return %arg0, %c0_i32 : i32, i32
  }
  func.func @transform_2(%arg0: i32) -> (i32, i32) {
    %c0_i32 = arith.constant 0 : i32
    %c0_i32_0 = arith.constant 0 : i32
    %c0_i32_1 = arith.constant 0 : i32
    return %c0_i32, %c0_i32_0 : i32, i32
  }
}

</mosaic_0001>

<bundles_post_ra>
// kernel: tpu_custom_call.1
= control target key start
LH: loop header
LB: loop body
LE: loop exit
PB: predicated region body
PF: predicated region fallthrough
CT: control target
= control target key end

     0   :  { %7 = vsyncpa [#allocation6], 0  ;;  %s290_s0 = inlined_call_operand.hbm [shape: f32[16,128], index: 0, kind: input, shape index: {}]   ;;  %s291_s1 = inlined_call_operand.hbm [shape: f32[16,128], index: 1, kind: input, shape index: {}]   ;;  %s292_s2 = inlined_call_operand.hbm [shape: f32[3,128], index: 2, kind: output, shape index: {}]  }
   0x1   :  { %8 = vsyncpa [#allocation9], 0 }
   0x2   :  { %9 = vsyncpa [#allocation7], 0  ;;  %s234_s9 = smov [#allocation5]   ;;  %s162_s13 = scalar_lea.hbm %s290_s0, 256 }
   0x3   :  { %s15_s10 = sshll.u32 %s234_s9, 4  ;;  %p163_p0 = scmp.ne.s32.totalorder %s290_s0, %s162_s13  ;;  %s16_s10 = int_to_ptr.vmem [resolvable:$true] %s15_s10 }
   0x4   :  { %p166_p1 = scmp.lt.u32.totalorder %s162_s13, %s290_s0 }
   0x6   :  { %p168_p2 = pnand %p166_p1, %p163_p0 }
   0x8   :  { %171 = shalt.err (!%p168_p2)
}
   0x9   :  { %s172_s18 = scalar_lea.vmem %s16_s10, 256  ;;  %p177_p4 = scmp.lt.s32.totalorder %s16_s10, %s16_s10 }
   0xa   :  { %p173_p3 = scmp.ne.s32.totalorder %s16_s10, %s172_s18  ;;  %p178_p5 = scmp.lt.s32.totalorder %s172_s18, %s172_s18 }
   0xc   :  { %p179_p6 = por %p178_p5, %p177_p4 }
   0xe   :  { %p180_p7 = pnand %p179_p6, %p173_p3 }
  0x10   :  { %183 = shalt.err (!%p180_p7)
}
  0x11   :  { %s235_s19 = smov 128   ;;  %s236_s20 = smov 8  }
  0x12   :  { %21 = dma.hbm_to_vmem [thread:$0]  %s290_s0, 256, %s16_s10, [#allocation6], %s235_s19, %s235_s19, %s236_s20  }
  0x13   :  { %s237_s23 = smov [#allocation8]   ;;  %s184_s27 = scalar_lea.hbm %s291_s1, 256 }
  0x14   :  { %s27_s24 = sshll.u32 %s237_s23, 4  ;;  %p185_p8 = scmp.ne.s32.totalorder %s291_s1, %s184_s27  ;;  %s28_s24 = int_to_ptr.vmem [resolvable:$true] %s27_s24 }
  0x15   :  { %p188_p9 = scmp.lt.u32.totalorder %s184_s27, %s291_s1 }
  0x17   :  { %p190_p10 = pnand %p188_p9, %p185_p8 }
  0x19   :  { %193 = shalt.err (!%p190_p10)
}
  0x1a   :  { %s194_s4 = scalar_lea.vmem %s28_s24, 256  ;;  %p199_p12 = scmp.lt.s32.totalorder %s28_s24, %s28_s24 }
  0x1b   :  { %p195_p11 = scmp.ne.s32.totalorder %s28_s24, %s194_s4  ;;  %p200_p13 = scmp.lt.s32.totalorder %s194_s4, %s194_s4 }
  0x1d   :  { %p201_p0 = por %p200_p13, %p199_p12 }
  0x1f   :  { %p202_p1 = pnand %p201_p0, %p195_p11 }
  0x21   :  { %205 = shalt.err (!%p202_p1)
}
  0x22   :  { %33 = dma.hbm_to_vmem [thread:$0]  %s291_s1, 256, %s28_s24, [#allocation9], %s235_s19, %s235_s19, %s236_s20  }
  0x23   :  { %228 = dma.done.wait [#allocation6], 256  }
  0x24   :  { %229 = vsyncadd [#allocation6], 4294967040 }
  0x25   :  { %230 = dma.done.wait [#allocation9], 256  }
  0x26   :  { %231 = vsyncadd [#allocation9], 4294967040  ;;  %v47_v0 = vld [vmem:[#allocation5] sm:$0xff]  ;;  %v48_v1 = vld [vmem:[#allocation5 + $0x8] sm:$0xff]  ;;  %s238_s1 = smov [#allocation10]  }
  0x27   :  { %v49_v2 = vld [vmem:[#allocation8] sm:$0xff]  ;;  %v50_v3 = vld [vmem:[#allocation8 + $0x8] sm:$0xff]  ;;  %v51_v4 = vmul.f32 0.5, %v47_v0  ;;  %v52_v5 = vmul.f32 0.5, %v48_v1  ;;  %s143_s6 = sshll.u32 %s238_s1, 4  ;;  %s144_s6 = int_to_ptr.vmem [resolvable:$true] %s143_s6 }
  0x28   :  { %v76_v6 = vadd.f32 %v50_v3, %v49_v2  ;;  %s206_s7 = scalar_lea.vmem %s144_s6, 64  ;;  %p211_p3 = scmp.lt.s32.totalorder %s144_s6, %s144_s6 }
  0x29   :  { %158 = vtanh.f32 %v51_v4  ;;  %p207_p2 = scmp.ne.s32.totalorder %s144_s6, %s206_s7  ;;  %p212_p4 = scmp.lt.s32.totalorder %s206_s7, %s206_s7 }
  0x2a   :  { %160 = vtanh.f32 %v52_v5  ;;  %v130_v7 = vrot.slane %v76_v6, 4 }
  0x2b   :  { %p213_p5 = por %p212_p4, %p211_p3 }
  0x2c   :  { %v131_v8 = vadd.f32 %v130_v7, %v76_v6 }
  0x2d   :  { %p214_p6 = pnand %p213_p5, %p207_p2 }
  0x2e   :  { %v132_v9 = vrot.slane %v131_v8, 2 }
  0x30   :  { %v133_v10 = vadd.f32 %v132_v9, %v131_v8 }
  0x32   :  { %v134_v11 = vrot.slane %v133_v10, 1 }
  0x33   :  { %v159_v12 = vpop.eup %158 }
  0x34   :  { %v161_v13 = vpop.eup %160  ;;  %v55_v14 = vadd.f32 1.0, %v159_v12  ;;  %v135_v15 = vadd.f32 %v134_v11, %v133_v10 }
  0x35   :  { %v56_v16 = vadd.f32 1.0, %v161_v13 }
  0x36   :  { %v57_v17 = vmul.f32 0.5, %v55_v14  ;;  %136 = vst [vmem:[#allocation10 + $0x2] sm:$0x1] %v135_v15 }
  0x37   :  { %v58_v18 = vmul.f32 0.5, %v56_v16 }
  0x38   :  { %v66_v19 = vmul.f32 %v57_v17, %v49_v2 }
  0x39   :  { %v67_v20 = vmul.f32 %v58_v18, %v50_v3  ;;  %v72_v21 = vadd.f32 %v58_v18, %v57_v17 }
  0x3b   :  { %v68_v22 = vadd.f32 %v67_v20, %v66_v19  ;;  %v122_v23 = vrot.slane %v72_v21, 4 }
  0x3d   :  { %v114_v24 = vrot.slane %v68_v22, 4  ;;  %v123_v25 = vadd.f32 %v122_v23, %v72_v21 }
  0x3f   :  { %v115_v26 = vadd.f32 %v114_v24, %v68_v22  ;;  %v124_v27 = vrot.slane %v123_v25, 2 }
  0x41   :  { %v116_v28 = vrot.slane %v115_v26, 2  ;;  %v125_v29 = vadd.f32 %v124_v27, %v123_v25 }
  0x43   :  { %v117_v30 = vadd.f32 %v116_v28, %v115_v26  ;;  %v126_v31 = vrot.slane %v125_v29, 1 }
  0x45   :  { %v118_v32 = vrot.slane %v117_v30, 1  ;;  %v127_v33 = vadd.f32 %v126_v31, %v125_v29 }
  0x47   :  { %v119_v34 = vadd.f32 %v118_v32, %v117_v30  ;;  %128 = vst [vmem:[#allocation10 + $0x1] sm:$0x1] %v127_v33 }
  0x49   :  { %120 = vst [vmem:[#allocation10] sm:$0x1] %v119_v34 }
  0x4a   :  { %217 = shalt.err (!%p214_p6)
}
  0x4b   :  { %s218_s10 = scalar_lea.hbm %s292_s2, 64 }
  0x4c   :  { %p219_p7 = scmp.ne.s32.totalorder %s292_s2, %s218_s10  ;;  %p222_p8 = scmp.lt.u32.totalorder %s218_s10, %s292_s2 }
  0x4e   :  { %p224_p9 = pnand %p222_p8, %p219_p7 }
  0x50   :  { %227 = shalt.err (!%p224_p9)
}
  0x51   :  { %146 = dma.vmem_to_hbm [thread:$0]  %s144_s6, 64, %s292_s2, [#allocation7]  }
  0x52   :  { %232 = dma.done.wait [#allocation7], 64  }
  0x53   :  { %233 = vsyncadd [#allocation7], 4294967232 }
  0x54   :  { %150 = vsyncpa [#allocation6], 1 }
  0x55   :  { %151 = vsyncpa [#allocation9], 1 }
  0x56   :  { %152 = vsyncpa [#allocation7], 1 }

</bundles_post_ra>
